<compile_context>
chip_gen: v5e
topology: v5e:2x2
jax: 0.10.0
libtpu: 0.0.40
codegen_flags: <defaults>
</compile_context>

<pallas_src>
import functools

import jax
import jax.numpy as jnp
from jax.experimental import pallas as pl
from jax.experimental.pallas import tpu as pltpu


LANES = 128                # vreg lane width: last block dim is lane-dense
ROW_ALIGN = 16             # covers f32 (8,128) and bf16 (16,128) sublane tiles
DEFAULT_TILE_ROWS = 2048   # 2048 x 128 x 4B = 1 MiB per pipeline buffer


def _round_up(x: int, m: int) -> int:
    return ((x + m - 1) // m) * m


def _elementwise_loss(x, loss_type, is_real):
    """Per-element adversarial loss on f32 values (used inside & outside kernel)."""
    if loss_type == "hinge":
        return jnp.maximum((1.0 - x) if is_real else (1.0 + x), 0.0)
    if loss_type == "vanilla":
        # BCE-with-logits vs all-ones / all-zeros targets == softplus(-x) / softplus(x)
        u = -x if is_real else x
        return jnp.maximum(u, 0.0) + jnp.log1p(jnp.exp(-jnp.abs(u)))
    if loss_type == "lsgan":
        d = (x - 1.0) if is_real else x
        return d * d
    raise ValueError(f"Unknown loss type: {loss_type}")


def _adversarial_sum_kernel(pred_ref, out_ref, acc_ref, *,
                            loss_type, is_real, tile_rows, valid_rows,
                            needs_tail_mask):
    """Streams (tile_rows, 128) logit blocks, folds each into a tiny (8, 128) f32
    running-sum scratch, and emits one (1, 8, 128) partial-sum tile per chunk."""
    c = pl.program_id(0)          # chunk index       ("parallel" axis)
    k = pl.program_id(1)          # step within chunk ("arbitrary" reduction axis)
    steps = pl.num_programs(1)

    @pl.when(k == 0)
    def _init():
        acc_ref[...] = jnp.zeros_like(acc_ref)

    x = pred_ref[...].astype(jnp.float32)            # (tile_rows, LANES)
    elem = _elementwise_loss(x, loss_type, is_real)  # per-element loss, f32

    groups = tile_rows // 8

    def _accumulate(vals):
        # Fold sublane-tile groups with pure VPU adds into the (8, 128) acc:
        # same add count as a full-tile accumulator, 1 vreg of acc traffic.
        acc_ref[...] += vals.reshape(groups, 8, LANES).sum(axis=0)

    if needs_tail_mask:
        # Only tail / overhanging tiles pay for the row mask (pl.when gated);
        # interior tiles accumulate unmasked.
        row_base = (c * steps + k) * tile_rows
        is_tail = row_base + tile_rows > valid_rows

        @pl.when(is_tail)
        def _masked():
            rows = jax.lax.broadcasted_iota(jnp.int32, elem.shape, 0) + row_base
            _accumulate(jnp.where(rows < valid_rows, elem, 0.0))

        @pl.when(jnp.logical_not(is_tail))
        def _interior():
            _accumulate(elem)
    else:
        _accumulate(elem)

    @pl.when(k == steps - 1)
    def _finalize():
        out_ref[...] = acc_ref[...].reshape(out_ref.shape)


def _num_chunks_for_device() -> int:
    # Only v7x has 2 TensorCores per chip; elsewhere a split is pure overhead.
    try:
        kind = jax.devices()[0].device_kind.lower()
    except Exception:
        return 1
    return 2 if ("v7" in kind or "7x" in kind) else 1


def _single_adversarial_loss(pred, is_real, loss_type, *,
                             tile_rows=DEFAULT_TILE_ROWS, num_chunks=None):
    if loss_type not in ("hinge", "vanilla", "lsgan"):
        raise ValueError(f"Unknown loss type: {loss_type}")

    pred = jnp.asarray(pred)
    n = int(pred.size)
    if n == 0:
        raise ValueError("AdversarialLoss: empty prediction")

    flat = pred.reshape(-1)
    rows_full = n // LANES           # complete 128-wide rows streamed by the kernel
    rem = n - rows_full * LANES      # <128 leftover elements folded in the wrapper

    # Tiny inputs (<128 elems): a fused XLA reduction beats any kernel launch.
    if rows_full == 0:
        tail = _elementwise_loss(flat.astype(jnp.float32), loss_type, is_real)
        return jnp.sum(tail) / jnp.float32(n)

    # Lane-dense slab with NO padded HBM copy: kernel streams the aligned prefix.
    x2d = flat[: rows_full * LANES].reshape(rows_full, LANES)

    # Megacore-aware chunking: choose nchunks first, then the tile.
    nchunks = int(num_chunks) if num_chunks is not None else _num_chunks_for_device()
    if rows_full < nchunks * ROW_ALIGN:
        nchunks = 1
    tile_r = min(int(tile_rows), _round_up(pl.cdiv(rows_full, nchunks), ROW_ALIGN))
    tile_r = max(ROW_ALIGN, _round_up(tile_r, ROW_ALIGN))
    steps = pl.cdiv(rows_full, nchunks * tile_r)
    last_block = pl.cdiv(rows_full, tile_r) - 1
    needs_tail_mask = (nchunks * steps * tile_r) != rows_full

    kernel = functools.partial(
        _adversarial_sum_kernel,
        loss_type=loss_type, is_real=bool(is_real), tile_rows=tile_r,
        valid_rows=rows_full, needs_tail_mask=needs_tail_mask)

    # Clamp so chunk-split never requests a block starting past the array; the
    # kernel fully masks such tiles (row_base >= valid_rows -> contributes 0).
    def in_map(c, k):
        return (jnp.minimum(c * steps + k, last_block), 0)

    partials = pl.pallas_call(
        kernel,
        out_shape=jax.ShapeDtypeStruct((nchunks, 8, LANES), jnp.float32),
        grid_spec=pltpu.PrefetchScalarGridSpec(
            num_scalar_prefetch=0,
            grid=(nchunks, steps),
            in_specs=[pl.BlockSpec((tile_r, LANES), in_map)],
            out_specs=pl.BlockSpec((1, 8, LANES), lambda c, k: (c, 0, 0)),
            scratch_shapes=[pltpu.VMEM((8, LANES), jnp.float32)]),
        compiler_params=pltpu.CompilerParams(
            dimension_semantics=("parallel", "arbitrary"),
            vmem_limit_bytes=32 * 1024 * 1024),
    )(x2d)

    total = jnp.sum(partials)
    if rem:
        tail = _elementwise_loss(flat[rows_full * LANES:].astype(jnp.float32),
                                 loss_type, is_real)
        total = total + jnp.sum(tail)
    # Exact mean over the true element count.
    return total / jnp.float32(n)


def adversarial_loss(predictions, is_real, loss_type="hinge", **kwargs):
    """Pallas implementation of AdversarialLoss.forward.

    predictions: array or list of arrays (discriminator logits, any shape/float dtype)
    is_real:     Python bool (static, as in the PyTorch API)
    loss_type:   'hinge' | 'vanilla' | 'lsgan'
    returns:     scalar float32 loss
    """
    if isinstance(predictions, (list, tuple)):
        # One pallas_call per scale; partial sums combined in the wrapper.
        # TODO(synk): fuse multi-scale predictions into a single pallas_call to
        # amortize launch overhead on tiny patch-GAN logits.
        losses = [_single_adversarial_loss(p, is_real, loss_type, **kwargs)
                  for p in predictions]
        return sum(losses) / len(losses)
    return _single_adversarial_loss(predictions, is_real, loss_type, **kwargs)


# ----------------------------------------------------------------------------
# Pure-JAX reference (mirrors the PyTorch module) for correctness checking.
# ----------------------------------------------------------------------------
def _reference(predictions, is_real, loss_type):
    def single(p):
        x = jnp.asarray(p, jnp.float32)
        if loss_type == "hinge":
            return jnp.mean(jnp.maximum((1.0 - x) if is_real else (1.0 + x), 0.0))
        if loss_type == "vanilla":
            t = 1.0 if is_real else 0.0
            return jnp.mean(jnp.maximum(x, 0.0) - x * t
                            + jnp.log1p(jnp.exp(-jnp.abs(x))))
        if loss_type == "lsgan":
            t = 1.0 if is_real else 0.0
            return jnp.mean((x - t) ** 2)
        raise ValueError(loss_type)

    if isinstance(predictions, (list, tuple)):
        return sum(single(p) for p in predictions) / len(predictions)
    return single(predictions)


if __name__ == "__main__":
    key = jax.random.PRNGKey(0)
    k1, k2, k3, k4 = jax.random.split(key, 4)

    # Small multi-scale patch-GAN style discriminator logits.
    pred_hi = jax.random.normal(k1, (2, 1, 16, 16), dtype=jnp.float32)
    pred_lo = jax.random.normal(k2, (2, 1, 8, 8), dtype=jnp.float32)
    pred_bf = jax.random.normal(k3, (2, 4, 16, 16),
                                dtype=jnp.float32).astype(jnp.bfloat16)
    # Non-128-divisible element count: exercises kernel + wrapper remainder path.
    pred_odd = jax.random.normal(k4, (2, 3, 61), dtype=jnp.float32)

    # List-of-predictions path, all loss types, both real/fake.
    for loss_type in ("hinge", "vanilla", "lsgan"):
        for is_real in (True, False):
            got = adversarial_loss([pred_hi, pred_lo], is_real,
                                   loss_type=loss_type)
            got = jax.block_until_ready(got)
            want = _reference([pred_hi, pred_lo], is_real, loss_type)
            assert jnp.allclose(got, want, rtol=1e-5, atol=1e-6), (
                loss_type, is_real, got, want)

    # Single-tensor path with a bf16 prediction (kernel upcasts internally).
    got = jax.block_until_ready(adversarial_loss(pred_bf, True,
                                                 loss_type="hinge"))
    want = _reference(pred_bf, True, "hinge")
    assert jnp.allclose(got, want, rtol=1e-5, atol=1e-6), (got, want)

    # Non-aligned element count (366 = 2 full rows + 110-element remainder).
    got = jax.block_until_ready(adversarial_loss(pred_odd, False,
                                                 loss_type="lsgan"))
    want = _reference(pred_odd, False, "lsgan")
    assert jnp.allclose(got, want, rtol=1e-5, atol=1e-6), (got, want)

    print("KERNEL_OK")
</pallas_src>

<mosaic_0001>
module attributes {stable_mosaic.version = 11 : i64} {
  func.func @_adversarial_sum_kernel(%arg0: i32, %arg1: i32, %arg2: memref<16x128xf32, #tpu.memory_space<vmem>>, %arg3: memref<1x8x128xf32, #tpu.memory_space<vmem>>, %arg4: memref<8x128xf32, #tpu.memory_space<vmem>>) attributes {dimension_semantics = [#tpu.dimension_semantics<parallel>, #tpu.dimension_semantics<arbitrary>], iteration_bounds = array<i64: 1, 1>, scalar_prefetch = 0 : i64, scratch_operands = 1 : i64, tpu.core_type = #tpu.core_type<tc>, window_params = [{transform_indices = @transform_0, window_bounds = array<i64: 16, 128>}, {transform_indices = @transform_1, window_bounds = array<i64: 1, 8, 128>}]} {
    %c0_i32 = arith.constant 0 : i32
    %0 = arith.cmpi eq, %arg1, %c0_i32 : i32
    %1 = arith.extui %0 : i1 to i32
    %c0_i32_0 = arith.constant 0 : i32
    %2 = arith.cmpi ne, %1, %c0_i32_0 : i32
    scf.if %2 {
      %cst_8 = arith.constant 0.000000e+00 : f32
      %21 = vector.broadcast %cst_8 : f32 to vector<8x128xf32>
      %c0_9 = arith.constant 0 : index
      %c0_10 = arith.constant 0 : index
      %22 = vector.load %arg4[%c0_9, %c0_10] : memref<8x128xf32, #tpu.memory_space<vmem>>, vector<8x128xf32>
      tpu.vector_store %arg4[%c0_9, %c0_10], %21 {strides = array<i32>} : memref<8x128xf32, #tpu.memory_space<vmem>>, vector<8x128xf32>,
    } else {
    }
    %c0 = arith.constant 0 : index
    %c0_1 = arith.constant 0 : index
    %3 = vector.load %arg2[%c0, %c0_1] : memref<16x128xf32, #tpu.memory_space<vmem>>, vector<16x128xf32>
    %cst = arith.constant 1.000000e+00 : f32
    %4 = vector.broadcast %cst : f32 to vector<16x128xf32>
    %5 = arith.subf %4, %3 : vector<16x128xf32>
    %cst_2 = arith.constant 0.000000e+00 : f32
    %6 = vector.broadcast %cst_2 : f32 to vector<16x128xf32>
    %7 = arith.maximumf %5, %6 : vector<16x128xf32>
    %c1_i32 = arith.constant 1 : i32
    %8 = arith.muli %arg0, %c1_i32 : i32
    %9 = arith.addi %8, %arg1 : i32
    %c16_i32 = arith.constant 16 : i32
    %10 = arith.muli %9, %c16_i32 : i32
    %c16_i32_3 = arith.constant 16 : i32
    %11 = arith.addi %10, %c16_i32_3 : i32
    %c4_i32 = arith.constant 4 : i32
    %12 = arith.cmpi sgt, %11, %c4_i32 : i32
    %13 = arith.extui %12 : i1 to i32
    %c0_i32_4 = arith.constant 0 : i32
    %14 = arith.cmpi ne, %13, %c0_i32_4 : i32
    scf.if %14 {
      %21 = tpu.iota {dimensions = array<i32: 0>} : vector<16x128xi32>
      %22 = vector.broadcast %10 : i32 to vector<16x128xi32>
      %23 = arith.addi %21, %22 : vector<16x128xi32>
      %c4_i32_8 = arith.constant 4 : i32
      %24 = vector.broadcast %c4_i32_8 : i32 to vector<16x128xi32>
      %25 = arith.cmpi slt, %23, %24 : vector<16x128xi32>
      %cst_9 = arith.constant 0.000000e+00 : f32
      %26 = vector.broadcast %cst_9 : f32 to vector<16x128xf32>
      %27 = arith.select %25, %7, %26 : vector<16x128xi1>, vector<16x128xf32>
      %c0_10 = arith.constant 0 : index
      %c0_11 = arith.constant 0 : index
      %28 = vector.load %arg4[%c0_10, %c0_11] : memref<8x128xf32, #tpu.memory_space<vmem>>, vector<8x128xf32>
      %29 = vector.shape_cast %27 : vector<16x128xf32> to vector<2x8x128xf32>
      %cst_12 = arith.constant dense<0.000000e+00> : vector<8x128xf32>
      %30 = vector.multi_reduction <add>, %29, %cst_12 [0] : vector<2x8x128xf32> to vector<8x128xf32>
      %31 = arith.addf %28, %30 : vector<8x128xf32>
      %c0_13 = arith.constant 0 : index
      %c0_14 = arith.constant 0 : index
      %32 = vector.load %arg4[%c0_13, %c0_14] : memref<8x128xf32, #tpu.memory_space<vmem>>, vector<8x128xf32>
      tpu.vector_store %arg4[%c0_13, %c0_14], %31 {strides = array<i32>} : memref<8x128xf32, #tpu.memory_space<vmem>>, vector<8x128xf32>,
    } else {
    }
    %true = arith.constant true
    %15 = arith.xori %12, %true : i1
    %16 = arith.extui %15 : i1 to i32
    %c0_i32_5 = arith.constant 0 : i32
    %17 = arith.cmpi ne, %16, %c0_i32_5 : i32
    scf.if %17 {
      %c0_8 = arith.constant 0 : index
      %c0_9 = arith.constant 0 : index
      %21 = vector.load %arg4[%c0_8, %c0_9] : memref<8x128xf32, #tpu.memory_space<vmem>>, vector<8x128xf32>
      %22 = vector.shape_cast %7 : vector<16x128xf32> to vector<2x8x128xf32>
      %cst_10 = arith.constant dense<0.000000e+00> : vector<8x128xf32>
      %23 = vector.multi_reduction <add>, %22, %cst_10 [0] : vector<2x8x128xf32> to vector<8x128xf32>
      %24 = arith.addf %21, %23 : vector<8x128xf32>
      %c0_11 = arith.constant 0 : index
      %c0_12 = arith.constant 0 : index
      %25 = vector.load %arg4[%c0_11, %c0_12] : memref<8x128xf32, #tpu.memory_space<vmem>>, vector<8x128xf32>
      tpu.vector_store %arg4[%c0_11, %c0_12], %24 {strides = array<i32>} : memref<8x128xf32, #tpu.memory_space<vmem>>, vector<8x128xf32>,
    } else {
    }
    %c0_i32_6 = arith.constant 0 : i32
    %18 = arith.cmpi eq, %arg1, %c0_i32_6 : i32
    %19 = arith.extui %18 : i1 to i32
    %c0_i32_7 = arith.constant 0 : i32
    %20 = arith.cmpi ne, %19, %c0_i32_7 : i32
    scf.if %20 {
      %c0_8 = arith.constant 0 : index
      %c0_9 = arith.constant 0 : index
      %21 = vector.load %arg4[%c0_8, %c0_9] : memref<8x128xf32, #tpu.memory_space<vmem>>, vector<8x128xf32>
      %22 = vector.shape_cast %21 : vector<8x128xf32> to vector<1x8x128xf32>
      %c0_10 = arith.constant 0 : index
      %c0_11 = arith.constant 0 : index
      %c0_12 = arith.constant 0 : index
      %23 = vector.load %arg3[%c0_10, %c0_11, %c0_12] : memref<1x8x128xf32, #tpu.memory_space<vmem>>, vector<1x8x128xf32>
      tpu.vector_store %arg3[%c0_10, %c0_11, %c0_12], %22 {strides = array<i32>} : memref<1x8x128xf32, #tpu.memory_space<vmem>>, vector<1x8x128xf32>,
    } else {
    }
    return
  }
  func.func @transform_0(%arg0: i32, %arg1: i32) -> (i32, i32) {
    %c1_i32 = arith.constant 1 : i32
    %0 = arith.muli %arg0, %c1_i32 : i32
    %1 = arith.addi %0, %arg1 : i32
    %c0_i32 = arith.constant 0 : i32
    %2 = arith.minsi %1, %c0_i32 : i32
    %c0_i32_0 = arith.constant 0 : i32
    %c0_i32_1 = arith.constant 0 : i32
    return %2, %c0_i32_0 : i32, i32
  }
  func.func @transform_1(%arg0: i32, %arg1: i32) -> (i32, i32, i32) {
    %c0_i32 = arith.constant 0 : i32
    %c0_i32_0 = arith.constant 0 : i32
    %c0_i32_1 = arith.constant 0 : i32
    return %arg0, %c0_i32, %c0_i32_0 : i32, i32, i32
  }
}

</mosaic_0001>

<bundles_post_ra>
// kernel: tpu_custom_call.1
= control target key start
LH: loop header
LB: loop body
LE: loop exit
PB: predicated region body
PF: predicated region fallthrough
CT: control target
= control target key end

     0   :  { %6 = vsyncpa [#allocation4], 0  ;;  %s182_s0 = inlined_call_operand.hbm [shape: f32[4,128], index: 0, kind: input, shape index: {}]   ;;  %s183_s1 = inlined_call_operand.hbm [shape: f32[1,8,128], index: 1, kind: output, shape index: {}]  }
   0x1   :  { %7 = vsyncpa [#allocation5], 0 }
   0x2   :  { %18 = vsyncadd [#allocation4], 192  ;;  %s23_s8 = sshll.u32 %s182_s0, 4  ;;  %s162_s9 = smov [#allocation3]   ;;  %s24_s8 = int_to_ptr.hbm [resolvable:$true] %s23_s8 }
   0x3   :  { %s25_s10 = sshll.u32 %s162_s9, 4  ;;  %s163_s11 = smov 64   ;;  %s26_s10 = int_to_ptr.vmem [resolvable:$true] %s25_s10 }
   0x4   :  { %s164_s12 = smov 4  }
   0x5   :  { %31 = dma.hbm_to_vmem [thread:$0]  %s24_s8, 64, %s26_s10, [#allocation4], %s163_s11, %s163_s11, %s164_s12  }
   0x6   :  { %158 = dma.done.wait [#allocation4], 256  }
   0x7   :  { %159 = vsyncadd [#allocation4], 4294967040  ;;  %v60_v0 = vlaneseq  ;;  %v47_v2 = vld [vmem:[#allocation3] sm:$0xff]  ;;  %s165_s13 = smov [#allocation6]   ;;  %s94_s17 = sshll.u32 %s183_s1, 4  ;;  %s95_s17 = int_to_ptr.hbm [resolvable:$true] %s94_s17 }
   0x8   :  { %v49_v3 = vsub.f32 1.0, %v47_v2  ;;  %s92_s14 = sshll.u32 %s165_s13, 4  ;;  %s93_s14 = int_to_ptr.vmem [resolvable:$true] %s92_s14 }
   0x9   :  { %v61_v1 = vshrl.u32 %v60_v0, 7 }
   0xa   :  { %v51_v4 = vmax.f32 %v49_v3, 0.0 }
   0xb   :  { %vm66_vm0 = vcmp.lt.s32.totalorder %v61_v1, 4 }
   0xc   :  { %v68_v5 = vsel %vm66_vm0, %v51_v4, 0.0 }
   0xd   :  { %86 = vst [vmem:[#allocation6] sm:$0xff] %v68_v5 }
   0xe   :  { %97 = dma.vmem_to_hbm [thread:$0]  %s93_s14, 128, %s95_s17, [#allocation5]  }
   0xf   :  { %160 = dma.done.wait [#allocation5], 128  }
  0x10   :  { %161 = vsyncadd [#allocation5], 4294967168 }
  0x11   :  { %102 = vsyncpa [#allocation4], 1 }
  0x12   :  { %103 = vsyncpa [#allocation5], 1 }

</bundles_post_ra>
